<compile_context>
chip_gen: v6e
topology: v6e:2x2x1
jax: 0.10.0
libtpu: 0.0.40
codegen_flags: <defaults>
</compile_context>

<pallas_src>
import jax
import jax.numpy as jnp
from jax.experimental import pallas as pl
from jax.experimental.pallas import tpu as pltpu


def _round_up(n, m):
    return ((n + m - 1) // m) * m


def _mlp_kernel(x_ref, w1_ref, b1_ref, w2_ref, b2_ref, w3_ref, b3_ref, o_ref):
    # x_ref:  (32, tile_b)  bf16   -- batch on the lane axis
    # w1_ref: (256, 32)     bf16,  b1_ref: (256, 1) f32
    # w2_ref: (256, 256)    bf16,  b2_ref: (256, 1) f32
    # w3_ref: (1, 256)      bf16,  b3_ref: (1,)     f32 (SMEM scalar)
    # o_ref:  (1, tile_b)   f32    -- lane-dense output row

    # Layer 1: (256,32) @ (32,tile_b) -> (256, tile_b), f32 accumulate, bias+ReLU in f32.
    h = jnp.dot(w1_ref[...], x_ref[...], preferred_element_type=jnp.float32)
    h = jnp.maximum(h + b1_ref[...], 0.0)

    # Layer 2: (256,256) @ (256,tile_b) -> (256, tile_b).
    h = jnp.dot(w2_ref[...], h.astype(jnp.bfloat16),
                preferred_element_type=jnp.float32)
    h = jnp.maximum(h + b2_ref[...], 0.0)

    # Layer 3: (1,256) @ (256,tile_b) -> (1, tile_b)  (lane-dense result row).
    y = jnp.dot(w3_ref[...], h.astype(jnp.bfloat16),
                preferred_element_type=jnp.float32)
    y = jnp.maximum(y + b3_ref[0], 0.0)

    o_ref[...] = y.astype(o_ref.dtype)


def mutual_info_system(x, params, *, tile_b=None):
    """Fused forward pass of MutualInfoSystem.

    x: (B, 32) float array
    params: dict with PyTorch-layout tensors:
        w1 (256,32), b1 (256,1), w2 (256,256), b2 (256,1), w3 (1,256), b3 (1,1)
    returns: (B, 1) float32
    """
    B, D = x.shape
    assert D == 32, "MutualInfoSystem expects 32 input features"

    if tile_b is None:
        # Real default: 128-aligned batch tile, capped so per-step VMEM stays small
        # (fits v5e's 16 MiB scoped default) while amortizing per-step overhead.
        tile_b = min(2048, _round_up(max(B, 1), 128))
    assert tile_b % 128 == 0, "tile_b must be a multiple of 128 (lane width)"

    Bp = _round_up(B, tile_b)
    num_tiles = Bp // tile_b

    # Pad batch, transpose so batch is on the lane axis, cast streaming input to bf16.
    x_pad = x if Bp == B else jnp.pad(x, ((0, Bp - B), (0, 0)))
    xT = x_pad.astype(jnp.bfloat16).T                       # (32, Bp)

    w1 = params["w1"].astype(jnp.bfloat16)                  # (256, 32)
    w2 = params["w2"].astype(jnp.bfloat16)                  # (256, 256)
    w3 = params["w3"].astype(jnp.bfloat16)                  # (1, 256)
    b1 = params["b1"].astype(jnp.float32)                   # (256, 1)
    b2 = params["b2"].astype(jnp.float32)                   # (256, 1)
    b3 = params["b3"].astype(jnp.float32).reshape((1,))     # (1,)  -> SMEM scalar

    flops = 2 * Bp * (32 * 256 + 256 * 256 + 256)
    bytes_accessed = (xT.size * 2 + w1.size * 2 + w2.size * 2 + w3.size * 2
                      + b1.size * 4 + b2.size * 4 + 4 + Bp * 4)

    const = lambda shape: pl.BlockSpec(shape, lambda i: (0, 0))

    out = pl.pallas_call(
        _mlp_kernel,
        out_shape=jax.ShapeDtypeStruct((1, Bp), jnp.float32),
        grid_spec=pltpu.PrefetchScalarGridSpec(
            num_scalar_prefetch=0,
            grid=(num_tiles,),
            in_specs=[
                pl.BlockSpec((D, tile_b), lambda i: (0, i)),   # streaming x tile
                const(w1.shape), const(b1.shape),              # grid-constant weights
                const(w2.shape), const(b2.shape),
                const(w3.shape),
                pl.BlockSpec(memory_space=pltpu.MemorySpace.SMEM),  # b3 scalar
            ],
            out_specs=pl.BlockSpec((1, tile_b), lambda i: (0, i)),  # lane-dense slab
        ),
        compiler_params=pltpu.CompilerParams(
            dimension_semantics=("parallel",),        # megacore-shardable batch axis
            vmem_limit_bytes=32 * 1024 * 1024,
        ),
        cost_estimate=pl.CostEstimate(
            flops=int(flops), transcendentals=0, bytes_accessed=int(bytes_accessed)),
    )(xT, w1, b1, w2, b2, w3, b3)

    # (1, Bp) lane-dense slab -> (B, 1) column (wrapper-side layout plumbing).
    return out[0, :B].reshape(B, 1)


def init_params(key):
    """Deterministic init mimicking nn.Linear's U(-1/sqrt(fan_in), 1/sqrt(fan_in)).

    Weights are kept in PyTorch (out_features, in_features) layout; biases as (out, 1).
    """
    k1, k2, k3, k4, k5, k6 = jax.random.split(key, 6)

    def lin(kw, kb, fan_in, fan_out):
        bound = 1.0 / (fan_in ** 0.5)
        w = jax.random.uniform(kw, (fan_out, fan_in), jnp.float32, -bound, bound)
        b = jax.random.uniform(kb, (fan_out, 1), jnp.float32, -bound, bound)
        return w, b

    w1, b1 = lin(k1, k2, 32, 256)
    w2, b2 = lin(k3, k4, 256, 256)
    w3, b3 = lin(k5, k6, 256, 1)
    return dict(w1=w1, b1=b1, w2=w2, b2=b2, w3=w3, b3=b3)


def reference_forward(x, p):
    """Pure-JAX reference matching the kernel's numerics (bf16 operands, f32 accum)."""
    w1 = p["w1"].astype(jnp.bfloat16)
    w2 = p["w2"].astype(jnp.bfloat16)
    w3 = p["w3"].astype(jnp.bfloat16)
    xb = x.astype(jnp.bfloat16)
    h = jnp.dot(xb, w1.T, preferred_element_type=jnp.float32) + p["b1"][:, 0]
    h = jnp.maximum(h, 0.0)
    h = jnp.dot(h.astype(jnp.bfloat16), w2.T, preferred_element_type=jnp.float32) + p["b2"][:, 0]
    h = jnp.maximum(h, 0.0)
    y = jnp.dot(h.astype(jnp.bfloat16), w3.T, preferred_element_type=jnp.float32) + p["b3"][:, 0]
    y = jnp.maximum(y, 0.0)
    return y  # (B, 1)


if __name__ == "__main__":
    key = jax.random.PRNGKey(0)
    kx, kp = jax.random.split(key)

    B = 8  # small batch consistent with the module's (N, 32) input
    x = jax.random.normal(kx, (B, 32), jnp.float32)
    params = init_params(kp)

    out = mutual_info_system(x, params)
    out = jax.block_until_ready(out)

    ref = reference_forward(x, params)
    assert out.shape == (B, 1)
    max_err = float(jnp.max(jnp.abs(out - ref)))
    assert jnp.allclose(out, ref, atol=1e-3, rtol=1e-2), f"mismatch vs reference: {max_err}"

    print("KERNEL_OK")
</pallas_src>

<mosaic_0001>
module attributes {stable_mosaic.version = 11 : i64} {
  func.func @_mlp_kernel(%arg0: i32, %arg1: memref<32x128xbf16, #tpu.memory_space<vmem>>, %arg2: memref<256x32xbf16, #tpu.memory_space<vmem>>, %arg3: memref<256x1xf32, #tpu.memory_space<vmem>>, %arg4: memref<256x256xbf16, #tpu.memory_space<vmem>>, %arg5: memref<256x1xf32, #tpu.memory_space<vmem>>, %arg6: memref<1x256xbf16, #tpu.memory_space<vmem>>, %arg7: memref<1xf32, #tpu.memory_space<smem>>, %arg8: memref<1x128xf32, #tpu.memory_space<vmem>>) attributes {dimension_semantics = [#tpu.dimension_semantics<parallel>], iteration_bounds = array<i64: 1>, scalar_prefetch = 0 : i64, scratch_operands = 0 : i64, tpu.core_type = #tpu.core_type<tc>, window_params = [{transform_indices = @transform_0, window_bounds = array<i64: 32, 128>}, {pipeline_mode = #tpu.pipeline_mode<synchronous>, transform_indices = @transform_1, window_bounds = array<i64: 256, 32>}, {pipeline_mode = #tpu.pipeline_mode<synchronous>, transform_indices = @transform_2, window_bounds = array<i64: 256, 1>}, {pipeline_mode = #tpu.pipeline_mode<synchronous>, transform_indices = @transform_3, window_bounds = array<i64: 256, 256>}, {pipeline_mode = #tpu.pipeline_mode<synchronous>, transform_indices = @transform_4, window_bounds = array<i64: 256, 1>}, {pipeline_mode = #tpu.pipeline_mode<synchronous>, transform_indices = @transform_5, window_bounds = array<i64: 1, 256>}, {transform_indices = @transform_6, window_bounds = array<i64: 1>}, {transform_indices = @transform_7, window_bounds = array<i64: 1, 128>}]} {
    %c0 = arith.constant 0 : index
    %c0_0 = arith.constant 0 : index
    %0 = vector.load %arg2[%c0, %c0_0] : memref<256x32xbf16, #tpu.memory_space<vmem>>, vector<256x32xbf16>
    %c0_1 = arith.constant 0 : index
    %c0_2 = arith.constant 0 : index
    %1 = vector.load %arg1[%c0_1, %c0_2] : memref<32x128xbf16, #tpu.memory_space<vmem>>, vector<32x128xbf16>
    %cst = arith.constant dense<0.000000e+00> : vector<256x128xf32>
    %2 = tpu.matmul %0, %1, %cst {dimension_numbers = #tpu.dot_dimension_numbers<[1], [0], [0], [1], [0, 0, 1, 1], [], []>} : vector<256x32xbf16>, vector<32x128xbf16>, vector<256x128xf32> -> vector<256x128xf32>
    %c0_3 = arith.constant 0 : index
    %c0_4 = arith.constant 0 : index
    %3 = vector.load %arg3[%c0_3, %c0_4] : memref<256x1xf32, #tpu.memory_space<vmem>>, vector<256x1xf32>
    %4 = vector.broadcast %3 : vector<256x1xf32> to vector<256x128xf32>
    %5 = arith.addf %2, %4 : vector<256x128xf32>
    %cst_5 = arith.constant 0.000000e+00 : f32
    %6 = vector.broadcast %cst_5 : f32 to vector<256x128xf32>
    %7 = arith.maximumf %5, %6 : vector<256x128xf32>
    %c0_6 = arith.constant 0 : index
    %c0_7 = arith.constant 0 : index
    %8 = vector.load %arg4[%c0_6, %c0_7] : memref<256x256xbf16, #tpu.memory_space<vmem>>, vector<256x256xbf16>
    %9 = arith.truncf %7 : vector<256x128xf32> to vector<256x128xbf16>
    %cst_8 = arith.constant dense<0.000000e+00> : vector<256x128xf32>
    %10 = tpu.matmul %8, %9, %cst_8 {dimension_numbers = #tpu.dot_dimension_numbers<[1], [0], [0], [1], [0, 0, 1, 1], [], []>} : vector<256x256xbf16>, vector<256x128xbf16>, vector<256x128xf32> -> vector<256x128xf32>
    %c0_9 = arith.constant 0 : index
    %c0_10 = arith.constant 0 : index
    %11 = vector.load %arg5[%c0_9, %c0_10] : memref<256x1xf32, #tpu.memory_space<vmem>>, vector<256x1xf32>
    %12 = vector.broadcast %11 : vector<256x1xf32> to vector<256x128xf32>
    %13 = arith.addf %10, %12 : vector<256x128xf32>
    %cst_11 = arith.constant 0.000000e+00 : f32
    %14 = vector.broadcast %cst_11 : f32 to vector<256x128xf32>
    %15 = arith.maximumf %13, %14 : vector<256x128xf32>
    %c0_12 = arith.constant 0 : index
    %c0_13 = arith.constant 0 : index
    %16 = vector.load %arg6[%c0_12, %c0_13] : memref<1x256xbf16, #tpu.memory_space<vmem>>, vector<1x256xbf16>
    %17 = arith.truncf %15 : vector<256x128xf32> to vector<256x128xbf16>
    %cst_14 = arith.constant dense<0.000000e+00> : vector<1x128xf32>
    %18 = tpu.matmul %16, %17, %cst_14 {dimension_numbers = #tpu.dot_dimension_numbers<[1], [0], [0], [1], [0, 0, 1, 1], [], []>} : vector<1x256xbf16>, vector<256x128xbf16>, vector<1x128xf32> -> vector<1x128xf32>
    %c0_15 = arith.constant 0 : index
    %19 = memref.load %arg7[%c0_15] : memref<1xf32, #tpu.memory_space<smem>>
    %20 = vector.broadcast %19 : f32 to vector<1x128xf32>
    %21 = arith.addf %18, %20 : vector<1x128xf32>
    %cst_16 = arith.constant 0.000000e+00 : f32
    %22 = vector.broadcast %cst_16 : f32 to vector<1x128xf32>
    %23 = arith.maximumf %21, %22 : vector<1x128xf32>
    %c0_17 = arith.constant 0 : index
    %c0_18 = arith.constant 0 : index
    %24 = vector.load %arg8[%c0_17, %c0_18] : memref<1x128xf32, #tpu.memory_space<vmem>>, vector<1x128xf32>
    tpu.vector_store %arg8[%c0_17, %c0_18], %23 {strides = array<i32>} : memref<1x128xf32, #tpu.memory_space<vmem>>, vector<1x128xf32>,
    return
  }
  func.func @transform_0(%arg0: i32) -> (i32, i32) {
    %c0_i32 = arith.constant 0 : i32
    %c0_i32_0 = arith.constant 0 : i32
    return %c0_i32, %arg0 : i32, i32
  }
  func.func @transform_1(%arg0: i32) -> (i32, i32) {
    %c0_i32 = arith.constant 0 : i32
    %c0_i32_0 = arith.constant 0 : i32
    %c0_i32_1 = arith.constant 0 : i32
    return %c0_i32, %c0_i32_0 : i32, i32
  }
  func.func @transform_2(%arg0: i32) -> (i32, i32) {
    %c0_i32 = arith.constant 0 : i32
    %c0_i32_0 = arith.constant 0 : i32
    %c0_i32_1 = arith.constant 0 : i32
    return %c0_i32, %c0_i32_0 : i32, i32
  }
  func.func @transform_3(%arg0: i32) -> (i32, i32) {
    %c0_i32 = arith.constant 0 : i32
    %c0_i32_0 = arith.constant 0 : i32
    %c0_i32_1 = arith.constant 0 : i32
    return %c0_i32, %c0_i32_0 : i32, i32
  }
  func.func @transform_4(%arg0: i32) -> (i32, i32) {
    %c0_i32 = arith.constant 0 : i32
    %c0_i32_0 = arith.constant 0 : i32
    %c0_i32_1 = arith.constant 0 : i32
    return %c0_i32, %c0_i32_0 : i32, i32
  }
  func.func @transform_5(%arg0: i32) -> (i32, i32) {
    %c0_i32 = arith.constant 0 : i32
    %c0_i32_0 = arith.constant 0 : i32
    %c0_i32_1 = arith.constant 0 : i32
    return %c0_i32, %c0_i32_0 : i32, i32
  }
  func.func @transform_6(%arg0: i32) -> i32 {
    %c0_i32 = arith.constant 0 : i32
    %c0_i32_0 = arith.constant 0 : i32
    return %c0_i32 : i32
  }
  func.func @transform_7(%arg0: i32) -> (i32, i32) {
    %c0_i32 = arith.constant 0 : i32
    %c0_i32_0 = arith.constant 0 : i32
    return %c0_i32, %arg0 : i32, i32
  }
}

</mosaic_0001>

<bundles_post_ra>
// kernel: tpu_custom_call.1
= control target key start
LH: loop header
LB: loop body
LE: loop exit
PB: predicated region body
PF: predicated region fallthrough
CT: control target
= control target key end

     0   :  { %v1648_v2 = vmov 0   ;;  %vm349_vm0 = vcmask 261120   ;;  %s2305_s0 = inlined_call_operand.vmem [shape: bf16[32,128], index: 0, kind: input, shape index: {}]   ;;  %s2306_s1 = inlined_call_operand.vmem [shape: bf16[256,32], index: 1, kind: input, shape index: {}]   ;;  %s2307_s2 = inlined_call_operand.vmem [shape: f32[256,1], index: 2, kind: input, shape index: {}]   ;;  %s2308_s3 = inlined_call_operand.vmem [shape: bf16[256,256], index: 3, kind: input, shape index: {}]   ;;  %s2309_s4 = inlined_call_operand.vmem [shape: f32[256,1], index: 4, kind: input, shape index: {}]   ;;  %s2310_s5 = inlined_call_operand.vmem [shape: bf16[1,256], index: 5, kind: input, shape index: {}]   ;;  %s2311_s6 = inlined_call_operand.<no memory space> [shape: f32[1], index: 6, kind: input, shape index: {}]   ;;  %s2312_s7 = inlined_call_operand.hbm [shape: f32[1,128], index: 7, kind: output, shape index: {}]  }
   0x1   :  { %v95_v0 = vld [vmem:[%s2307_s2 + $0xf0] sm:$0xff]  ;;  %1559 = vset.pattern.permute.xlu1 %v1648_v2  ;;  %1558 = vset.pattern.permute.xlu0 %v1648_v2  ;;  %v1560_v3 = vld [vmem:[%s2305_s0 + $0x8] sm:$0xff]   ;;  %v96_v4 = vld [vmem:[%s2307_s2 + $0xf8] sm:$0xff] }
   0x2   :  { %v79_v1 = vld [vmem:[%s2307_s2 + $0x70] sm:$0xff]  ;;  %249 = vperm.xlu0 %1558, %v95_v0   ;;  %1503 = vmatprep.subr.bf16.mxu0 %v1560_v3  ;;  %v80_v5 = vld [vmem:[%s2307_s2 + $0x78] sm:$0xff]  ;;  %v1561_v6 = vld [vmem:[%s2305_s0] sm:$0xff]  }
   0x3   :  { %169 = vperm.xlu1 %1559, %v79_v1   ;;  %1504 = vmatpush3.bf16.msra.mxu0 %v1560_v3  ;;  %v1562_v7 = vld [vmem:[%s2306_s1] sm:$0xff]   ;;  %v94_v9 = vld [vmem:[%s2307_s2 + $0xe8] sm:$0xff]  ;;  %v1564_v11 = vld [vmem:[%s2306_s1 + $0x10] sm:$0xff]  }
   0x4   :  { %1505 = vmatprep.subr.bf16.mxu0 %v1561_v6  ;;  %v93_v8 = vld [vmem:[%s2307_s2 + $0xe0] sm:$0xff]  ;;  %1507 = vmatprep.mubr.msk.bf16.mxu0 %vm349_vm0, %v1562_v7  ;;  %v1563_v10 = vld [vmem:[%s2306_s1 + $0x8] sm:$0xff]   ;;  %v92_v14 = vld [vmem:[%s2307_s2 + $0xd8] sm:$0xff] }
   0x5   :  { %v78_v12 = vld [vmem:[%s2307_s2 + $0x68] sm:$0xff]  ;;  %v77_v13 = vld [vmem:[%s2307_s2 + $0x60] sm:$0xff]  ;;  %v91_v15 = vld [vmem:[%s2307_s2 + $0xd0] sm:$0xff] }
   0x6   :  { %254 = vperm.xlu0 %1558, %v96_v4   ;;  %v1565_v16 = vld [vmem:[%s2306_s1 + $0x18] sm:$0xff]   ;;  %v1566_v17 = vld [vmem:[%s2306_s1 + $0x20] sm:$0xff]   ;;  %v75_v19 = vld [vmem:[%s2307_s2 + $0x50] sm:$0xff] }
   0x7   :  { %174 = vperm.xlu1 %1559, %v80_v5   ;;  %1506 = vmatpush3.bf16.msra.mxu0 %v1561_v6  ;;  %v76_v18 = vld [vmem:[%s2307_s2 + $0x58] sm:$0xff]  ;;  %v90_v20 = vld [vmem:[%s2307_s2 + $0xc8] sm:$0xff]  ;;  %v89_v21 = vld [vmem:[%s2307_s2 + $0xc0] sm:$0xff] }
   0x8   :  { %v1567_v22 = vld [vmem:[%s2306_s1 + $0x28] sm:$0xff]   ;;  %v1568_v23 = vld [vmem:[%s2306_s1 + $0x30] sm:$0xff]   ;;  %v73_v25 = vld [vmem:[%s2307_s2 + $0x40] sm:$0xff] }
   0x9   :  { %v74_v24 = vld [vmem:[%s2307_s2 + $0x48] sm:$0xff]  ;;  %v88_v26 = vld [vmem:[%s2307_s2 + $0xb8] sm:$0xff]  ;;  %v87_v27 = vld [vmem:[%s2307_s2 + $0xb0] sm:$0xff] }
   0xa   :  { %239 = vperm.xlu0 %1558, %v93_v8   ;;  %1508 = vmatmul.mubr.msk.bf16.vlgmr.msra.gmra.mxu0 %vm349_vm0, %v1563_v10  ;;  %v1569_v28 = vld [vmem:[%s2306_s1 + $0x38] sm:$0xff]   ;;  %v1570_v29 = vld [vmem:[%s2306_s1 + $0x40] sm:$0xff]   ;;  %v71_v31 = vld [vmem:[%s2307_s2 + $0x30] sm:$0xff] }
   0xb   :  { %244 = vperm.xlu1 %1559, %v94_v9   ;;  %1511 = vmatprep.mubr.msk.bf16.mxu0 %vm349_vm0, %v1564_v11  ;;  %v72_v30 = vld [vmem:[%s2307_s2 + $0x38] sm:$0xff]  ;;  %v86_v32 = vld [vmem:[%s2307_s2 + $0xa8] sm:$0xff]  ;;  %v85_v33 = vld [vmem:[%s2307_s2 + $0xa0] sm:$0xff] }
   0xc   :  { %v1571_v34 = vld [vmem:[%s2306_s1 + $0x48] sm:$0xff]   ;;  %v1572_v35 = vld [vmem:[%s2306_s1 + $0x50] sm:$0xff]   ;;  %v69_v37 = vld [vmem:[%s2307_s2 + $0x20] sm:$0xff] }
   0xd   :  { %v70_v36 = vld [vmem:[%s2307_s2 + $0x28] sm:$0xff]  ;;  %v84_v38 = vld [vmem:[%s2307_s2 + $0x98] sm:$0xff]  ;;  %v83_v39 = vld [vmem:[%s2307_s2 + $0x90] sm:$0xff] }
   0xe   :  { %159 = vperm.xlu0 %1558, %v77_v13   ;;  %v1573_v40 = vld [vmem:[%s2306_s1 + $0x58] sm:$0xff]   ;;  %v1574_v41 = vld [vmem:[%s2306_s1 + $0x60] sm:$0xff]  }
   0xf   :  { %164 = vperm.xlu1 %1559, %v78_v12  }
  0x12   :  { %229 = vperm.xlu0 %1558, %v91_v15   ;;  %1512 = vmatmul.mubr.msk.bf16.gmra.mxu0 %vm349_vm0, %v1565_v16 }
  0x13   :  { %234 = vperm.xlu1 %1559, %v92_v14   ;;  %1515 = vmatprep.mubr.msk.bf16.mxu0 %vm349_vm0, %v1566_v17 }
  0x16   :  { %149 = vperm.xlu0 %1558, %v75_v19  }
  0x17   :  { %154 = vperm.xlu1 %1559, %v76_v18  }
  0x1a   :  { %219 = vperm.xlu0 %1558, %v89_v21   ;;  %1516 = vmatmul.mubr.msk.bf16.gmra.mxu0 %vm349_vm0, %v1567_v22 }
  0x1b   :  { %224 = vperm.xlu1 %1559, %v90_v20   ;;  %1519 = vmatprep.mubr.msk.bf16.mxu0 %vm349_vm0, %v1568_v23 }
  0x1e   :  { %139 = vperm.xlu0 %1558, %v73_v25  }
  0x1f   :  { %144 = vperm.xlu1 %1559, %v74_v24  }
  0x22   :  { %209 = vperm.xlu0 %1558, %v87_v27   ;;  %1520 = vmatmul.mubr.msk.bf16.gmra.mxu0 %vm349_vm0, %v1569_v28 }
  0x23   :  { %214 = vperm.xlu1 %1559, %v88_v26   ;;  %1523 = vmatprep.mubr.msk.bf16.mxu0 %vm349_vm0, %v1570_v29 }
  0x26   :  { %129 = vperm.xlu0 %1558, %v71_v31  }
  0x27   :  { %134 = vperm.xlu1 %1559, %v72_v30  }
  0x2a   :  { %199 = vperm.xlu0 %1558, %v85_v33   ;;  %1524 = vmatmul.mubr.msk.bf16.gmra.mxu0 %vm349_vm0, %v1571_v34 }
  0x2b   :  { %204 = vperm.xlu1 %1559, %v86_v32   ;;  %1527 = vmatprep.mubr.msk.bf16.mxu0 %vm349_vm0, %v1572_v35 }
  0x2e   :  { %119 = vperm.xlu0 %1558, %v69_v37  }
  0x2f   :  { %124 = vperm.xlu1 %1559, %v70_v36  }
  0x32   :  { %189 = vperm.xlu0 %1558, %v83_v39  }
  0x33   :  { %194 = vperm.xlu1 %1559, %v84_v38  }
  0x34   :  { %13 = vsyncpa [#allocation4], 0  ;;  %1528 = vmatmul.mubr.msk.bf16.gmra.mxu0 %vm349_vm0, %v1573_v40  ;;  %v68_v42 = vld [vmem:[%s2307_s2 + $0x18] sm:$0xff]  ;;  %v67_v43 = vld [vmem:[%s2307_s2 + $0x10] sm:$0xff]  ;;  %s1650_s25 = smov [#allocation3]  }
  0x35   :  { %1531 = vmatprep.mubr.msk.bf16.mxu0 %vm349_vm0, %v1574_v41  ;;  %v82_v44 = vld [vmem:[%s2307_s2 + $0x88] sm:$0xff]  ;;  %v81_v45 = vld [vmem:[%s2307_s2 + $0x80] sm:$0xff]  ;;  %v1576_v47 = vld [vmem:[%s2306_s1 + $0x70] sm:$0xff]   ;;  %s1276_s26 = sshll.u32 %s1650_s25, 4  ;;  %s1277_s26 = int_to_ptr.vmem [resolvable:$true] %s1276_s26 }
  0x36   :  { %109 = vperm.xlu0 %1558, %v67_v43   ;;  %v1575_v46 = vld [vmem:[%s2306_s1 + $0x68] sm:$0xff]   ;;  %v65_v49 = vld [vmem:[%s2307_s2] sm:$0xff]  ;;  %v670_v50 = vld [vmem:[%s2309_s4 + $0xf8] sm:$0xff]  ;;  %s1626_s27 = scalar_lea.vmem %s1277_s26, 16  ;;  %s1630_s28 = scalar_lea.vmem %s1277_s26, 32 }
  0x37   :  { %114 = vperm.xlu1 %1559, %v68_v42   ;;  %v66_v48 = vld [vmem:[%s2307_s2 + $0x8] sm:$0xff]  ;;  %v669_v51 = vld [vmem:[%s2309_s4 + $0xf0] sm:$0xff]  ;;  %v1577_v52 = vld [vmem:[%s2306_s1 + $0x78] sm:$0xff]   ;;  %p1627_p0 = scmp.ne.s32.totalorder %s1277_s26, %s1626_s27  ;;  %p1631_p1 = scmp.lt.s32.totalorder %s1277_s26, %s1277_s26 }
  0x38   :  { %v654_v53 = vld [vmem:[%s2309_s4 + $0x78] sm:$0xff]  ;;  %v653_v54 = vld [vmem:[%s2309_s4 + $0x70] sm:$0xff]  ;;  %v668_v55 = vld [vmem:[%s2309_s4 + $0xe8] sm:$0xff]  ;;  %p1632_p2 = scmp.lt.s32.totalorder %s1630_s28, %s1626_s27 }
  0x39   :  { %v667_v56 = vld [vmem:[%s2309_s4 + $0xe0] sm:$0xff]  ;;  %v652_v57 = vld [vmem:[%s2309_s4 + $0x68] sm:$0xff]  ;;  %v666_v59 = vld [vmem:[%s2309_s4 + $0xd8] sm:$0xff] }
  0x3a   :  { %179 = vperm.xlu0 %1558, %v81_v45   ;;  %v651_v58 = vld [vmem:[%s2309_s4 + $0x60] sm:$0xff]  ;;  %v665_v60 = vld [vmem:[%s2309_s4 + $0xd0] sm:$0xff]  ;;  %v650_v61 = vld [vmem:[%s2309_s4 + $0x58] sm:$0xff]  ;;  %p1633_p3 = por %p1632_p2, %p1631_p1 }
  0x3b   :  { %184 = vperm.xlu1 %1559, %v82_v44   ;;  %v649_v62 = vld [vmem:[%s2309_s4 + $0x50] sm:$0xff]  ;;  %v664_v63 = vld [vmem:[%s2309_s4 + $0xc8] sm:$0xff]  ;;  %v663_v0 = vld [vmem:[%s2309_s4 + $0xc0] sm:$0xff] }
  0x3c   :  { %1532 = vmatmul.mubr.msk.bf16.gmra.mxu0 %vm349_vm0, %v1575_v46  ;;  %v648_v1 = vld [vmem:[%s2309_s4 + $0x48] sm:$0xff]  ;;  %v647_v2 = vld [vmem:[%s2309_s4 + $0x40] sm:$0xff]  ;;  %v662_v3 = vld [vmem:[%s2309_s4 + $0xb8] sm:$0xff]  ;;  %p1634_p4 = pnand %p1633_p3, %p1627_p0 }
  0x3d   :  { %1535 = vmatprep.mubr.msk.bf16.mxu0 %vm349_vm0, %v1576_v47  ;;  %v661_v4 = vld [vmem:[%s2309_s4 + $0xb0] sm:$0xff]  ;;  %v646_v5 = vld [vmem:[%s2309_s4 + $0x38] sm:$0xff]  ;;  %v660_v7 = vld [vmem:[%s2309_s4 + $0xa8] sm:$0xff] }
  0x3e   :  { %99 = vperm.xlu0 %1558, %v65_v49   ;;  %v645_v6 = vld [vmem:[%s2309_s4 + $0x30] sm:$0xff]  ;;  %v659_v8 = vld [vmem:[%s2309_s4 + $0xa0] sm:$0xff]  ;;  %v644_v9 = vld [vmem:[%s2309_s4 + $0x28] sm:$0xff] }
  0x3f   :  { %104 = vperm.xlu1 %1559, %v66_v48   ;;  %v643_v10 = vld [vmem:[%s2309_s4 + $0x20] sm:$0xff]  ;;  %v658_v11 = vld [vmem:[%s2309_s4 + $0x98] sm:$0xff]  ;;  %v657_v12 = vld [vmem:[%s2309_s4 + $0x90] sm:$0xff] }
  0x40   :  { %v642_v13 = vld [vmem:[%s2309_s4 + $0x18] sm:$0xff]  ;;  %v641_v14 = vld [vmem:[%s2309_s4 + $0x10] sm:$0xff]  ;;  %v656_v15 = vld [vmem:[%s2309_s4 + $0x88] sm:$0xff] }
  0x41   :  { %v655_v16 = vld [vmem:[%s2309_s4 + $0x80] sm:$0xff]  ;;  %v640_v17 = vld [vmem:[%s2309_s4 + $0x8] sm:$0xff]  ;;  %v1583_v39 = vld [vmem:[%s2308_s3 + $0x54] ss:$8 sps:$4 sm:$0xff]  }
  0x42   :  { %823 = vperm.xlu0 %1558, %v669_v51   ;;  %v639_v18 = vld [vmem:[%s2309_s4] sm:$0xff]  ;;  %1063 = vmatprep.mubr.bf16.mxu1 %v1583_v39 }
  0x43   :  { %828 = vperm.xlu1 %1559, %v670_v50   ;;  %v1580_v38 = vld [vmem:[%s2308_s3 + $0x4] ss:$8 sps:$4 sm:$0xff]  }
  0x44   :  { %1536 = vmatmul.mubr.msk.bf16.gmra.mxu0 %vm349_vm0, %v1577_v52 }
  0x45   :  { %1023 = vmatprep.mubr.bf16.mxu0 %v1580_v38 }
  0x46   :  { %743 = vperm.xlu0 %1558, %v653_v54  }
  0x47   :  { %748 = vperm.xlu1 %1559, %v654_v53  }
  0x4a   :  { %813 = vperm.xlu0 %1558, %v667_v56  }
  0x4b   :  { %818 = vperm.xlu1 %1559, %v668_v55  }
  0x4e   :  { %733 = vperm.xlu0 %1558, %v651_v58  }
  0x4f   :  { %738 = vperm.xlu1 %1559, %v652_v57  }
  0x52   :  { %803 = vperm.xlu0 %1558, %v665_v60  }
  0x53   :  { %808 = vperm.xlu1 %1559, %v666_v59  }
  0x56   :  { %723 = vperm.xlu0 %1558, %v649_v62  }
  0x57   :  { %728 = vperm.xlu1 %1559, %v650_v61  }
  0x5a   :  { %793 = vperm.xlu0 %1558, %v663_v0  }
  0x5b   :  { %798 = vperm.xlu1 %1559, %v664_v63  }
  0x5e   :  { %713 = vperm.xlu0 %1558, %v647_v2  }
  0x5f   :  { %718 = vperm.xlu1 %1559, %v648_v1  }
  0x62   :  { %783 = vperm.xlu0 %1558, %v661_v4  }
  0x63   :  { %788 = vperm.xlu1 %1559, %v662_v3  }
  0x66   :  { %703 = vperm.xlu0 %1558, %v645_v6  }
  0x67   :  { %708 = vperm.xlu1 %1559, %v646_v5  }
  0x6a   :  { %773 = vperm.xlu0 %1558, %v659_v8  }
  0x6b   :  { %778 = vperm.xlu1 %1559, %v660_v7  }
  0x6e   :  { %693 = vperm.xlu0 %1558, %v643_v10  }
  0x6f   :  { %698 = vperm.xlu1 %1559, %v644_v9  }
  0x72   :  { %763 = vperm.xlu0 %1558, %v657_v12  }
  0x73   :  { %768 = vperm.xlu1 %1559, %v658_v11  }
  0x76   :  { %683 = vperm.xlu0 %1558, %v641_v14  }
  0x77   :  { %688 = vperm.xlu1 %1559, %v642_v13  }
  0x7a   :  { %753 = vperm.xlu0 %1558, %v655_v16  }
  0x7b   :  { %758 = vperm.xlu1 %1559, %v656_v15  }
  0x7d   :  { %v1953_v19 = vpop.permute.xlu0 %249 }
  0x7e   :  { %v1955_v20 = vpop.permute.xlu1 %169  ;;  %673 = vperm.xlu0 %1558, %v639_v18  }
  0x7f   :  { %678 = vperm.xlu1 %1559, %v640_v17  }
  0x81   :  { %v1957_v21 = vpop.permute.xlu0 %254 }
  0x82   :  { %v1959_v22 = vpop.permute.xlu1 %174 }
  0x85   :  { %v1961_v23 = vpop.permute.xlu0 %239 }
  0x86   :  { %v1963_v24 = vpop.permute.xlu1 %244 }
  0x89   :  { %v1965_v25 = vpop.permute.xlu0 %159 }
  0x8a   :  { %v1967_v26 = vpop.permute.xlu1 %164 }
  0x8d   :  { %v1969_v27 = vpop.permute.xlu0 %229 }
  0x8e   :  { %v1971_v28 = vpop.permute.xlu1 %234 }
  0x91   :  { %v1973_v29 = vpop.permute.xlu0 %149 }
  0x92   :  { %v1975_v30 = vpop.permute.xlu1 %154 }
  0x95   :  { %v1977_v31 = vpop.permute.xlu0 %219 }
  0x96   :  { %v1979_v32 = vpop.permute.xlu1 %224 }
  0x99   :  { %v1981_v33 = vpop.permute.xlu0 %139 }
  0x9a   :  { %v1983_v34 = vpop.permute.xlu1 %144 }
  0x9d   :  { %v1985_v35 = vpop.permute.xlu0 %209 }
  0x9e   :  { %v1987_v36 = vpop.permute.xlu1 %214 }
  0xa1   :  { %v130_v37 = vpop.permute.xlu0 %129 }
  0xa2   :  { %v135_v40 = vpop.permute.xlu1 %134 }
  0xa5   :  { %v1995_v41 = vpop.permute.xlu0 %199 }
  0xa6   :  { %v1997_v42 = vpop.permute.xlu1 %204 }
  0xa9   :  { %v120_v43 = vpop.permute.xlu0 %119 }
  0xaa   :  { %v125_v44 = vpop.permute.xlu1 %124 }
  0xad   :  { %v1999_v45 = vpop.permute.xlu0 %189 }
  0xae   :  { %v2001_v46 = vpop.permute.xlu1 %194 }
  0xb1   :  { %v110_v47 = vpop.permute.xlu0 %109 }
  0xb2   :  { %v115_v48 = vpop.permute.xlu1 %114 }
  0xb5   :  { %v2003_v49 = vpop.permute.xlu0 %179 }
  0xb6   :  { %v2005_v51 = vpop.permute.xlu1 %184 }
  0xb9   :  { %v100_v54 = vpop.permute.xlu0 %99 }
  0xba   :  { %v105_v58 = vpop.permute.xlu1 %104 }
  0xca   :  { %v1509_v50 = vpop.f32.mrf.mxu0 }
  0xcb   :  { %v441_v53 = vadd.f32 %v1509_v50, %v110_v47 }
  0xcc   :  { %v432_v52 = vpop.f32.mrf.mxu0 }
  0xcd   :  { %v433_v56 = vadd.f32 %v432_v52, %v100_v54  ;;  %v561_v60 = vmax.f32 %v441_v53, 0.0 }
  0xce   :  { %v1510_v55 = vpop.f32.mrf.mxu0 }
  0xcf   :  { %v444_v57 = vadd.f32 %v1510_v55, %v115_v48  ;;  %v559_v0 = vmax.f32 %v433_v56, 0.0 }
  0xd0   :  { %v435_v59 = vpop.f32.mrf.mxu0 }
  0xd1   :  { %v562_v61 = vmax.f32 %v444_v57, 0.0  ;;  %v436_v62 = vadd.f32 %v435_v59, %v105_v58 }
  0xd2   :  { %v1513_v63 = vpop.f32.mrf.mxu0 }
  0xd3   :  { %v2007_v1 = vpack.c.bf16 %v562_v61, %v561_v60  ;;  %v560_v2 = vmax.f32 %v436_v62, 0.0  ;;  %v457_v5 = vadd.f32 %v1513_v63, %v130_v37 }
  0xd4   :  { %v448_v3 = vpop.f32.mrf.mxu0 }
  0xd5   :  { %v2009_v4 = vpack.c.bf16 %v560_v2, %v559_v0  ;;  %v449_v7 = vadd.f32 %v448_v3, %v120_v43  ;;  %v565_v10 = vmax.f32 %v457_v5, 0.0 }
  0xd6   :  { %v1514_v6 = vpop.f32.mrf.mxu0 }
  0xd7   :  { %v460_v8 = vadd.f32 %v1514_v6, %v135_v40  ;;  %v563_v14 = vmax.f32 %v449_v7, 0.0 }
  0xd8   :  { %v451_v9 = vpop.f32.mrf.mxu0 }
  0xd9   :  { %v566_v11 = vmax.f32 %v460_v8, 0.0  ;;  %v452_v12 = vadd.f32 %v451_v9, %v125_v44 }
  0xda   :  { %v1517_v13 = vpop.f32.mrf.mxu0 }
  0xdb   :  { %v2011_v15 = vpack.c.bf16 %v566_v11, %v565_v10  ;;  %v564_v16 = vmax.f32 %v452_v12, 0.0 }
  0xdc   :  { %v2013_v17 = vpop.f32.mrf.mxu0 }
  0xdd   :  { %v2015_v18 = vpack.c.bf16 %v564_v16, %v563_v14 }
  0xde   :  { %v1518_v38 = vpop.f32.mrf.mxu0 }
  0xe0   :  { %v467_v39 = vpop.f32.mrf.mxu0 }
  0xe2   :  { %v1521_v47 = vpop.f32.mrf.mxu0 }
  0xe3   :  { %v489_v2 = vadd.f32 %v1521_v47, %v1955_v20 }
  0xe4   :  { %v480_v37 = vpop.f32.mrf.mxu0 }
  0xe5   :  { %v573_v14 = vmax.f32 %v489_v2, 0.0 }
  0xe6   :  { %v1522_v48 = vpop.f32.mrf.mxu0 }
  0xe7   :  { %v492_v62 = vadd.f32 %v1522_v48, %v1959_v22 }
  0xe8   :  { %v483_v43 = vpop.f32.mrf.mxu0 }
  0xe9   :  { %v574_v7 = vmax.f32 %v492_v62, 0.0  ;;  %v484_v8 = vadd.f32 %v483_v43, %v1967_v26 }
  0xea   :  { %v2017_v40 = vpop.f32.mrf.mxu0 }
  0xeb   :  { %v630_v48 = vpack.c.bf16 %v574_v7, %v573_v14  ;;  %v1594_v7 = vld [vmem:[%s2308_s3 + $0x20] ss:$8 sps:$4 sm:$0xff]   ;;  %v1604_v14 = vld [vmem:[%s2308_s3 + $0x94] ss:$8 sps:$4 sm:$0xff]  }
  0xec   :  { %v2019_v50 = vpop.f32.mrf.mxu0 }
  0xee   :  { %v2021_v44 = vpop.f32.mrf.mxu0 }
  0xf0   :  { %v2023_v52 = vpop.f32.mrf.mxu0 }
  0xf4   :  { %v1529_v53 = vpop.f32.mrf.mxu0 }
  0xf6   :  { %v2025_v54 = vpop.f32.mrf.mxu0 }
  0xf8   :  { %v1530_v55 = vpop.f32.mrf.mxu0 }
  0xfa   :  { %v515_v56 = vpop.f32.mrf.mxu0 }
  0xfc   :  { %v1533_v57 = vpop.f32.mrf.mxu0 }
  0xfd   :  { %v537_v20 = vadd.f32 %v1533_v57, %v1969_v27  ;;  %v524_v57 = vadd.f32 %v1530_v55, %v1987_v36 }
  0xfe   :  { %v528_v58 = vpop.f32.mrf.mxu0 }
  0xff   :  { %v529_v27 = vadd.f32 %v528_v58, %v1977_v31 }
 0x100   :  { %v1534_v59 = vpop.f32.mrf.mxu0 }
 0x101   :  { %v540_v10 = vadd.f32 %v1534_v59, %v1971_v28 }
 0x102   :  { %v531_v60 = vpop.f32.mrf.mxu0 }
 0x103   :  { %v586_v26 = vmax.f32 %v540_v10, 0.0  ;;  %v532_v43 = vadd.f32 %v531_v60, %v1979_v32  ;;  %v1598_v10 = vld [vmem:[%s2308_s3 + $0x84] ss:$8 sps:$4 sm:$0xff]  }
 0x104   :  { %v1537_v61 = vpop.f32.mrf.mxu0 }
 0x105   :  { %v553_v0 = vadd.f32 %v1537_v61, %v1953_v19  ;;  %v481_v19 = vadd.f32 %v480_v37, %v1965_v25  ;;  %v572_v61 = vmax.f32 %v484_v8, 0.0  ;;  %v585_v25 = vmax.f32 %v537_v20, 0.0  ;;  %v1595_v8 = vld [vmem:[%s2308_s3 + $0x70] ss:$8 sps:$4 sm:$0xff]  }
 0x106   :  { %v544_v63 = vpop.f32.mrf.mxu0  ;;  %v584_v60 = vmax.f32 %v532_v43, 0.0  ;;  %v1607_v20 = vld [vmem:[%s2308_s3 + $0x90] ss:$8 sps:$4 sm:$0xff]  }
 0x107   :  { %v545_v5 = vadd.f32 %v544_v63, %v1961_v23  ;;  %v589_v11 = vmax.f32 %v553_v0, 0.0  ;;  %v571_v59 = vmax.f32 %v481_v19, 0.0  ;;  %v636_v32 = vpack.c.bf16 %v586_v26, %v585_v25  ;;  %v1606_v19 = vld [vmem:[%s2308_s3 + $0x40] ss:$8 sps:$4 sm:$0xff]   ;;  %v1617_v26 = vld [vmem:[%s2308_s3 + $0xd4] ss:$8 sps:$4 sm:$0xff]  }
 0x108   :  { %v1538_v3 = vpop.f32.mrf.mxu0  ;;  %v583_v63 = vmax.f32 %v529_v27, 0.0  ;;  %v582_v0 = vmax.f32 %v524_v57, 0.0  ;;  %v1619_v43 = vld [vmem:[%s2308_s3 + $0xd0] ss:$8 sps:$4 sm:$0xff]   ;;  %v2155_v27 = vpop.permute.xlu0 %823 }
 0x109   :  { %v556_v6 = vadd.f32 %v1538_v3, %v1957_v21  ;;  %v587_v16 = vmax.f32 %v545_v5, 0.0  ;;  %v476_v21 = vadd.f32 %v1518_v38, %v1975_v30  ;;  %v468_v30 = vadd.f32 %v467_v39, %v1983_v34  ;;  %v1625_v25 = vld [vmem:[%s2308_s3 + $0xf0] ss:$8 sps:$4 sm:$0xff]  }
 0x10a   :  { %v547_v9 = vpop.f32.mrf.mxu0  ;;  %v629_v38 = vpack.c.bf16 %v572_v61, %v571_v59  ;;  %v516_v34 = vadd.f32 %v515_v56, %v1997_v42  ;;  %v635_v39 = vpack.c.bf16 %v584_v60, %v583_v63  ;;  %v505_v42 = vadd.f32 %v2017_v40, %v1999_v45  ;;  %v1616_v61 = vld [vmem:[%s2308_s3 + $0xc0] ss:$8 sps:$4 sm:$0xff]   ;;  %v1623_v59 = vld [vmem:[%s2308_s3 + $0xf4] ss:$8 sps:$4 sm:$0xff]  }
 0x10b   :  { %v590_v12 = vmax.f32 %v556_v6, 0.0  ;;  %v548_v22 = vadd.f32 %v547_v9, %v1963_v24  ;;  %v473_v24 = vadd.f32 %v1517_v13, %v1973_v29  ;;  %v570_v37 = vmax.f32 %v476_v21, 0.0  ;;  %v1592_v6 = vld [vmem:[%s2308_s3 + $0x74] ss:$8 sps:$4 sm:$0xff]   ;;  %v1613_v21 = vld [vmem:[%s2308_s3 + $0xb0] ss:$8 sps:$4 sm:$0xff]  }
 0x10c   :  { %v465_v29 = vadd.f32 %v2013_v17, %v1981_v33  ;;  %v521_v13 = vadd.f32 %v1529_v53, %v1985_v35  ;;  %v568_v58 = vmax.f32 %v468_v30, 0.0  ;;  %v513_v33 = vadd.f32 %v2025_v54, %v1995_v41  ;;  %v1596_v9 = vld [vmem:[%s2308_s3 + $0x34] ss:$8 sps:$4 sm:$0xff]   ;;  %v2159_v30 = vpop.permute.xlu0 %743 }
 0x10d   :  { %v638_v47 = vpack.c.bf16 %v590_v12, %v589_v11  ;;  %v588_v23 = vmax.f32 %v548_v22, 0.0  ;;  %v569_v62 = vmax.f32 %v473_v24, 0.0  ;;  %v508_v35 = vadd.f32 %v2021_v44, %v2001_v46  ;;  %v1600_v11 = vld [vmem:[%s2308_s3 + $0x30] ss:$8 sps:$4 sm:$0xff]   ;;  %v1601_v12 = vld [vmem:[%s2308_s3 + $0x80] ss:$8 sps:$4 sm:$0xff]  }
 0x10e   :  { %v567_v36 = vmax.f32 %v465_v29, 0.0  ;;  %v581_v55 = vmax.f32 %v521_v13, 0.0  ;;  %v580_v2 = vmax.f32 %v516_v34, 0.0  ;;  %v579_v56 = vmax.f32 %v513_v33, 0.0  ;;  %v1602_v22 = vld [vmem:[%s2308_s3 + $0x44] ss:$8 sps:$4 sm:$0xff]  }
 0x10f   :  { %v637_v28 = vpack.c.bf16 %v588_v23, %v587_v16  ;;  %1369 = vmatprep.subr.bf16.mxu0 %v638_v47  ;;  %1539 = vmatprep.subr.bf16.mxu1 %v638_v47  ;;  %v628_v31 = vpack.c.bf16 %v570_v37, %v569_v62  ;;  %v578_v3 = vmax.f32 %v508_v35, 0.0  ;;  %v500_v41 = vadd.f32 %v2023_v52, %v2005_v51  ;;  %v1590_v52 = vld [vmem:[%s2308_s3 + $0x24] ss:$8 sps:$4 sm:$0xff]   ;;  %v1610_v47 = vld [vmem:[%s2308_s3 + $0xa0] ss:$8 sps:$4 sm:$0xff]   ;;  %v2157_v37 = vpop.permute.xlu1 %828 }
 0x110   :  { %1370 = vmatpush3.bf16.msra.mxu0 %v630_v48  ;;  %1547 = vmatpush3.bf16.msra.mxu1 %v630_v48  ;;  %v627_v17 = vpack.c.bf16 %v568_v58, %v567_v36  ;;  %v634_v53 = vpack.c.bf16 %v582_v0, %v581_v55  ;;  %v633_v54 = vpack.c.bf16 %v580_v2, %v579_v56  ;;  %v577_v46 = vmax.f32 %v505_v42, 0.0  ;;  %v1608_v16 = vld [vmem:[%s2308_s3 + $0xa4] ss:$8 sps:$4 sm:$0xff]   ;;  %v1611_v23 = vld [vmem:[%s2308_s3 + $0xb4] ss:$8 sps:$4 sm:$0xff]   ;;  %v2163_v57 = vpop.permute.xlu0 %813 }
 0x111   :  { %1371 = vmatprep.subr.bf16.mxu0 %v637_v28  ;;  %1540 = vmatprep.subr.bf16.mxu1 %v637_v28  ;;  %v497_v44 = vadd.f32 %v2019_v50, %v2003_v49  ;;  %v576_v45 = vmax.f32 %v500_v41, 0.0  ;;  %v1578_v49 = vld [vmem:[%s2308_s3] ss:$8 sps:$4 sm:$0xff]   ;;  %v1588_v50 = vld [vmem:[%s2308_s3 + $0x10] ss:$8 sps:$4 sm:$0xff]   ;;  %v1215_v33 = vlaneseq }
 0x112   :  { %v632_v5 = vpack.c.bf16 %v578_v3, %v577_v46  ;;  %v1614_v48 = vld [vmem:[%s2308_s3 + $0xc4] ss:$8 sps:$4 sm:$0xff]   ;;  %v1622_v24 = vld [vmem:[%s2308_s3 + $0xe0] ss:$8 sps:$4 sm:$0xff]   ;;  %v1649_v36 = vmov 1966171168  }
 0x113   :  { %v575_v40 = vmax.f32 %v497_v44, 0.0  ;;  %v1620_v28 = vld [vmem:[%s2308_s3 + $0xe4] ss:$8 sps:$4 sm:$0xff]   ;;  %v1213_v55 = vunpack.c.l.s4 %v1649_v36  ;;  %v1216_v35 = vshrl.u32 %v1215_v33, 7 }
 0x114   :  { %1372 = vmatpush3.bf16.msra.mxu0 %v629_v38  ;;  %1548 = vmatpush3.bf16.msra.mxu1 %v629_v38  ;;  %v2161_v38 = vpop.permute.xlu1 %748  ;;  %v734_v60 = vpop.permute.xlu0 %733 }
 0x115   :  { %1373 = vmatprep.subr.bf16.mxu0 %v636_v32  ;;  %1541 = vmatprep.subr.bf16.mxu1 %v636_v32  ;;  %v631_v51 = vpack.c.bf16 %v576_v45, %v575_v40 }
 0x118   :  { %1374 = vmatpush3.bf16.msra.mxu0 %v628_v31  ;;  %1549 = vmatpush3.bf16.msra.mxu1 %v628_v31  ;;  %v2165_v32 = vpop.permute.xlu1 %818  ;;  %v2167_v29 = vpop.permute.xlu0 %803 }
 0x119   :  { %1375 = vmatprep.subr.bf16.mxu0 %v635_v39  ;;  %1542 = vmatprep.subr.bf16.mxu1 %v635_v39 }
 0x11c   :  { %1376 = vmatpush3.bf16.msra.mxu0 %v627_v17  ;;  %1550 = vmatpush3.bf16.msra.mxu1 %v627_v17  ;;  %v739_v62 = vpop.permute.xlu1 %738  ;;  %v724_v63 = vpop.permute.xlu0 %723  ;;  %v1214_v17 = vunpack.c.0.s8 %v1213_v55 }
 0x11d   :  { %1377 = vmatprep.subr.bf16.mxu0 %v634_v53  ;;  %1543 = vmatprep.subr.bf16.mxu1 %v634_v53  ;;  %v2182_v53 = vld.sshfl [vmem:[%s2310_s5] sm:$0x11 pattern:$0x75316420] }
 0x11e   :  { %2315 = vst [vmem:[#allocation6_spill] sm:$0xff] %v2182_v53  ;;  %v1211_v42 = vcombine.high %v2182_v53, %v2182_v53  ;;  %v2188_v56 = vsub.s32 %v1214_v17, %v1216_v35 }
 0x120   :  { %1378 = vmatpush3.bf16.msra.mxu0 %v2011_v15  ;;  %1551 = vmatpush3.bf16.msra.mxu1 %v2011_v15  ;;  %v1581_v15 = vld [vmem:[%s2308_s3 + $0x50] ss:$8 sps:$4 sm:$0xff]   ;;  %v2169_v13 = vpop.permute.xlu1 %808  ;;  %v2171_v58 = vpop.permute.xlu0 %793  ;;  %2316 = vst [vmem:[#allocation7_spill] sm:$0xff] %v2188_v56 }
 0x121   :  { %1379 = vmatprep.subr.bf16.mxu0 %v633_v54  ;;  %1544 = vmatprep.subr.bf16.mxu1 %v633_v54  ;;  %v1225_v54 = vrot.slane %v1211_v42, %v2188_v56 }
 0x124   :  { %1380 = vmatpush3.bf16.msra.mxu0 %v2015_v18  ;;  %1552 = vmatpush3.bf16.msra.mxu1 %v2015_v18  ;;  %v1584_v18 = vld [vmem:[%s2308_s3 + $0x14] ss:$8 sps:$4 sm:$0xff]   ;;  %v729_v31 = vpop.permute.xlu1 %728  ;;  %v2175_v34 = vpop.permute.xlu0 %713 }
 0x125   :  { %1381 = vmatprep.subr.bf16.mxu0 %v632_v5  ;;  %1545 = vmatprep.subr.bf16.mxu1 %v632_v5 }
 0x128   :  { %1382 = vmatpush3.bf16.msra.mxu0 %v2007_v1  ;;  %1553 = vmatpush3.bf16.msra.mxu1 %v2007_v1  ;;  %v1586_v1 = vld [vmem:[%s2308_s3 + $0x64] ss:$8 sps:$4 sm:$0xff]   ;;  %v2173_v0 = vpop.permute.xlu1 %798  ;;  %v2184_v2 = vpop.permute.xlu0 %783 }
 0x129   :  { %1383 = vmatprep.subr.bf16.mxu0 %v631_v51  ;;  %1546 = vmatprep.subr.bf16.mxu1 %v631_v51 }
 0x12c   :  { %1384 = vmatpush3.bf16.msra.mxu0 %v2009_v4  ;;  %1554 = vmatpush3.bf16.msra.mxu1 %v2009_v4  ;;  %v1589_v4 = vld [vmem:[%s2308_s3 + $0x60] ss:$8 sps:$4 sm:$0xff]   ;;  %v2177_v39 = vpop.permute.xlu1 %718  ;;  %v2195_v46 = vpop.permute.xlu0 %703 }
 0x12f   :  { %1024 = vmatmul.mubr.bf16.vlgmr.msra.gmra.mxu0 %v1578_v49  ;;  %1064 = vmatmul.mubr.bf16.vlgmr.msra.gmra.mxu1 %v1581_v15 }
 0x130   :  { %1031 = vmatprep.mubr.bf16.mxu0 %v1584_v18  ;;  %1071 = vmatprep.mubr.bf16.mxu1 %v1586_v1  ;;  %v2190_v3 = vpop.permute.xlu1 %788  ;;  %v2199_v49 = vpop.permute.xlu0 %773 }
 0x131   :  { %2317 = vst [vmem:[#allocation8_spill] sm:$0xff] %v2199_v49 }
 0x134   :  { %v2197_v5 = vpop.permute.xlu1 %708 }
 0x137   :  { %1032 = vmatmul.mubr.bf16.gmra.mxu0 %v1588_v50  ;;  %1072 = vmatmul.mubr.bf16.gmra.mxu1 %v1589_v4 }
 0x138   :  { %1039 = vmatprep.mubr.bf16.mxu0 %v1590_v52  ;;  %1079 = vmatprep.mubr.bf16.mxu1 %v1592_v6  ;;  %v2201_v50 = vpop.permute.xlu1 %778 }
 0x13f   :  { %1040 = vmatmul.mubr.bf16.gmra.mxu0 %v1594_v7  ;;  %1080 = vmatmul.mubr.bf16.gmra.mxu1 %v1595_v8 }
 0x140   :  { %1047 = vmatprep.mubr.bf16.mxu0 %v1596_v9  ;;  %1087 = vmatprep.mubr.bf16.mxu1 %v1598_v10  ;;  %v2203_v10 = vpop.permute.xlu0 %693 }
 0x141   :  { %2318 = vst [vmem:[#allocation9_spill] sm:$0xff] %v2203_v10 }
 0x147   :  { %1048 = vmatmul.mubr.bf16.gmra.mxu0 %v1600_v11  ;;  %1088 = vmatmul.mubr.bf16.gmra.mxu1 %v1601_v12 }
 0x148   :  { %1055 = vmatprep.mubr.bf16.mxu0 %v1602_v22  ;;  %1095 = vmatprep.mubr.bf16.mxu1 %v1604_v14  ;;  %v2207_v22 = vpop.permute.xlu1 %698 }
 0x149   :  { %2320 = vst [vmem:[#allocation11_spill] sm:$0xff] %v2207_v22 }
 0x14f   :  { %1056 = vmatmul.mubr.bf16.gmra.mxu0 %v1606_v19  ;;  %1096 = vmatmul.mubr.bf16.gmra.mxu1 %v1607_v20 }
 0x150   :  { %1103 = vmatprep.mubr.bf16.mxu1 %v1608_v16  ;;  %1260 = vmatprep.mubr.bf16.mxu0 %v1225_v54 }
 0x157   :  { %1104 = vmatmul.mubr.bf16.gmra.mxu1 %v1610_v47 }
 0x158   :  { %1111 = vmatprep.mubr.bf16.mxu1 %v1611_v23 }
 0x15f   :  { %1112 = vmatmul.mubr.bf16.gmra.mxu1 %v1613_v21  ;;  %v764_v21 = vpop.permute.xlu0 %763 }
 0x160   :  { %1119 = vmatprep.mubr.bf16.mxu1 %v1614_v48 }
 0x163   :  { %v2218_v55 = vpop.permute.xlu0 %683 }
 0x164   :  { %2324 = vst [vmem:[#allocation15_spill] sm:$0xff] %v2218_v55 }
 0x167   :  { %1120 = vmatmul.mubr.bf16.gmra.mxu1 %v1616_v61 }
 0x168   :  { %1127 = vmatprep.mubr.bf16.mxu1 %v1617_v26 }
 0x16f   :  { %1128 = vmatmul.mubr.bf16.gmra.mxu1 %v1619_v43 }
 0x170   :  { %1135 = vmatprep.mubr.bf16.mxu1 %v1620_v28 }
 0x177   :  { %1136 = vmatmul.mubr.bf16.gmra.mxu1 %v1622_v24  ;;  %v769_v24 = vpop.permute.xlu1 %768 }
 0x178   :  { %1143 = vmatprep.mubr.bf16.mxu1 %v1623_v59 }
 0x17b   :  { %v2221_v17 = vpop.permute.xlu1 %688 }
 0x17c   :  { %2325 = vst [vmem:[#allocation16_spill] sm:$0xff] %v2221_v17 }
 0x17f   :  { %1144 = vmatmul.mubr.bf16.gmra.mxu1 %v1625_v25 }
 0x1ef   :  { %v1415_v44 = vpop.f32.mrf.mxu1  ;;  %v2209_v19 = vpop.f32.mrf.mxu0 }
 0x1f0   :  { %2321 = vst [vmem:[#allocation12_spill] sm:$0xff] %v2209_v19 }
 0x1f1   :  { %v1416_v45 = vpop.f32.mrf.mxu1  ;;  %v2211_v61 = vpop.f32.mrf.mxu0 }
 0x1f2   :  { %v1417_v40 = vadd.f32 %v1416_v45, %v1415_v44  ;;  %2322 = vst [vmem:[#allocation13_spill] sm:$0xff] %v2211_v61 }
 0x1f3   :  { %v1418_v51 = vpop.f32.mrf.mxu1 }
 0x1f4   :  { %v1066_v18 = vadd.f32 %v1417_v40, %v724_v63 }
 0x1f5   :  { %v1419_v15 = vpop.f32.mrf.mxu1 }
 0x1f6   :  { %v1420_v1 = vadd.f32 %v1419_v15, %v1418_v51  ;;  %v1162_v7 = vmax.f32 %v1066_v18, 0.0  ;;  %v754_v15 = vpop.permute.xlu0 %753 }
 0x1f7   :  { %v1421_v4 = vpop.f32.mrf.mxu1 }
 0x1f8   :  { %v1069_v52 = vadd.f32 %v1420_v1, %v729_v31  ;;  %v2215_v31 = vpop.f32.mrf.mxu0 }
 0x1f9   :  { %v1422_v6 = vpop.f32.mrf.mxu1  ;;  %2323 = vst [vmem:[#allocation14_spill] sm:$0xff] %v2215_v31 }
 0x1fa   :  { %v1163_v8 = vmax.f32 %v1069_v52, 0.0  ;;  %v1423_v9 = vadd.f32 %v1422_v6, %v1421_v4  ;;  %v2223_v42 = vpop.f32.mrf.mxu0  ;;  %v759_v52 = vpop.permute.xlu1 %758 }
 0x1fb   :  { %v1424_v11 = vpop.f32.mrf.mxu1  ;;  %2326 = vst [vmem:[#allocation17_spill] sm:$0xff] %v2223_v42 }
 0x1fc   :  { %v2205_v12 = vpack.c.bf16 %v1163_v8, %v1162_v7  ;;  %v1074_v20 = vadd.f32 %v1423_v9, %v734_v60 }
 0x1fd   :  { %v1425_v14 = vpop.f32.mrf.mxu1 }
 0x1fe   :  { %2319 = vst [vmem:[#allocation10_spill] sm:$0xff] %v2205_v12  ;;  %v1426_v16 = vadd.f32 %v1425_v14, %v1424_v11  ;;  %v1164_v26 = vmax.f32 %v1074_v20, 0.0 }
 0x1ff   :  { %v1427_v47 = vpop.f32.mrf.mxu1 }
 0x200   :  { %v1077_v23 = vadd.f32 %v1426_v16, %v739_v62 }
 0x201   :  { %v1428_v48 = vpop.f32.mrf.mxu1 }
 0x202   :  { %v1165_v43 = vmax.f32 %v1077_v23, 0.0  ;;  %v1429_v28 = vadd.f32 %v1428_v48, %v1427_v47 }
 0x203   :  { %v1430_v59 = vpop.f32.mrf.mxu1 }
 0x204   :  { %v2213_v25 = vpack.c.bf16 %v1165_v43, %v1164_v26  ;;  %v1082_v36 = vadd.f32 %v1429_v28, %v2159_v30  ;;  %v2227_v30 = vpop.f32.mrf.mxu0 }
 0x205   :  { %v1431_v63 = vpop.f32.mrf.mxu1  ;;  %2327 = vst [vmem:[#allocation18_spill] sm:$0xff] %v2227_v30 }
 0x206   :  { %v1432_v60 = vadd.f32 %v1431_v63, %v1430_v59  ;;  %v1166_v54 = vmax.f32 %v1082_v36, 0.0  ;;  %v2229_v8 = vpop.f32.mrf.mxu0 }
 0x207   :  { %v1433_v62 = vpop.f32.mrf.mxu1  ;;  %2328 = vst [vmem:[#allocation19_spill] sm:$0xff] %v2229_v8 }
 0x208   :  { %v1085_v33 = vadd.f32 %v1432_v60, %v2161_v38  ;;  %v2233_v23 = vpop.f32.mrf.mxu0 }
 0x209   :  { %v1434_v35 = vpop.f32.mrf.mxu1  ;;  %2330 = vst [vmem:[#allocation21_spill] sm:$0xff] %v2233_v23 }
 0x20a   :  { %v1167_v44 = vmax.f32 %v1085_v33, 0.0  ;;  %v1435_v45 = vadd.f32 %v1434_v35, %v1433_v62  ;;  %v2239_v63 = vpop.f32.mrf.mxu0 }
 0x20b   :  { %v1436_v40 = vpop.f32.mrf.mxu1  ;;  %2331 = vst [vmem:[#allocation22_spill] sm:$0xff] %v2239_v63 }
 0x20c   :  { %v2225_v51 = vpack.c.bf16 %v1167_v44, %v1166_v54  ;;  %v1090_v1 = vadd.f32 %v1435_v45, %v754_v15  ;;  %v2247_v54 = vpop.f32.mrf.mxu0 }
 0x20d   :  { %v1437_v18 = vpop.f32.mrf.mxu1 }
 0x20e   :  { %v1438_v4 = vadd.f32 %v1437_v18, %v1436_v40  ;;  %v1168_v9 = vmax.f32 %v1090_v1, 0.0  ;;  %v2249_v45 = vpop.f32.mrf.mxu0 }
 0x20f   :  { %v1439_v6 = vpop.f32.mrf.mxu1 }
 0x210   :  { %v1093_v38 = vadd.f32 %v1438_v4, %v759_v52  ;;  %v2251_v15 = vpop.f32.mrf.mxu0 }
 0x211   :  { %v1440_v7 = vpop.f32.mrf.mxu1 }
 0x212   :  { %v1169_v11 = vmax.f32 %v1093_v38, 0.0  ;;  %v1441_v14 = vadd.f32 %v1440_v7, %v1439_v6  ;;  %v2253_v4 = vpop.f32.mrf.mxu0 }
 0x213   :  { %v1442_v20 = vpop.f32.mrf.mxu1 }
 0x214   :  { %v2231_v16 = vpack.c.bf16 %v1169_v11, %v1168_v9  ;;  %v1098_v48 = vadd.f32 %v1441_v14, %v764_v21  ;;  %v1403_v38 = vpop.f32.mrf.mxu0 }
 0x215   :  { %v1443_v47 = vpop.f32.mrf.mxu1 }
 0x216   :  { %2329 = vst [vmem:[#allocation20_spill] sm:$0xff] %v2231_v16  ;;  %v1444_v26 = vadd.f32 %v1443_v47, %v1442_v20  ;;  %v1170_v36 = vmax.f32 %v1098_v48, 0.0  ;;  %v1404_v11 = vpop.f32.mrf.mxu0 }
 0x217   :  { %v2235_v43 = vpop.f32.mrf.mxu1 }
 0x218   :  { %v1101_v28 = vadd.f32 %v1444_v26, %v769_v24  ;;  %v1406_v47 = vpop.f32.mrf.mxu0 }
 0x219   :  { %v2237_v59 = vpop.f32.mrf.mxu1 }
 0x21a   :  { %v1171_v60 = vmax.f32 %v1101_v28, 0.0  ;;  %v1407_v28 = vpop.f32.mrf.mxu0 }
 0x21b   :  { %v2241_v62 = vpop.f32.mrf.mxu1 }
 0x21c   :  { %v2243_v33 = vpack.c.bf16 %v1171_v60, %v1170_v36  ;;  %v1409_v41 = vpop.f32.mrf.mxu0 }
 0x21d   :  { %v2245_v35 = vpop.f32.mrf.mxu1 }
 0x21e   :  { %2332 = vst [vmem:[#allocation23_spill] sm:$0xff] %v2243_v33  ;;  %v1410_v16 = vpop.f32.mrf.mxu0 }
 0x21f   :  { %v1451_v44 = vpop.f32.mrf.mxu1 }
 0x220   :  { %v1412_v42 = vpop.f32.mrf.mxu0 }
 0x221   :  { %v1452_v21 = vpop.f32.mrf.mxu1 }
 0x222   :  { %v1413_v12 = vpop.f32.mrf.mxu0 }
 0x223   :  { %v1454_v40 = vpop.f32.mrf.mxu1 }
 0x225   :  { %v1455_v24 = vpop.f32.mrf.mxu1 }
 0x227   :  { %v1457_v18 = vpop.f32.mrf.mxu1 }
 0x229   :  { %v1458_v1 = vpop.f32.mrf.mxu1 }
 0x22b   :  { %v1460_v52 = vpop.f32.mrf.mxu1 }
 0x22d   :  { %v1461_v6 = vpop.f32.mrf.mxu1 }
 0x22e   :  { %v1462_v49 = vadd.f32 %v1461_v6, %v1460_v52 }
 0x22f   :  { %v1463_v7 = vpop.f32.mrf.mxu1 }
 0x231   :  { %v1464_v9 = vpop.f32.mrf.mxu1 }
 0x232   :  { %v1465_v22 = vadd.f32 %v1464_v9, %v1463_v7  ;;  %v2342_v7 = vld [vmem:[#allocation17_spill] sm:$0xff] }
 0x233   :  { %v1466_v14 = vpop.f32.mrf.mxu1 }
 0x235   :  { %v1467_v20 = vpop.f32.mrf.mxu1 }
 0x236   :  { %v1468_v31 = vadd.f32 %v1467_v20, %v1466_v14  ;;  %v1130_v14 = vadd.f32 %v1465_v22, %v2167_v29 }
 0x237   :  { %v1469_v48 = vpop.f32.mrf.mxu1 }
 0x239   :  { %v1470_v26 = vpop.f32.mrf.mxu1 }
 0x23a   :  { %v1471_v19 = vadd.f32 %v1470_v26, %v1469_v48  ;;  %v1459_v26 = vadd.f32 %v1458_v1, %v1457_v18  ;;  %v2338_v1 = vld [vmem:[#allocation18_spill] sm:$0xff] }
 0x23b   :  { %v1472_v36 = vpop.f32.mrf.mxu1 }
 0x23c   :  { %v1138_v63 = vadd.f32 %v1471_v19, %v2163_v57  ;;  %v1453_v19 = vadd.f32 %v1452_v21, %v1451_v44  ;;  %v2336_v44 = vld [vmem:[#allocation22_spill] sm:$0xff]  ;;  %v2337_v21 = vld [vmem:[#allocation11_spill] sm:$0xff] }
 0x23d   :  { %v1473_v60 = vpop.f32.mrf.mxu1 }
 0x23e   :  { %v1474_v33 = vadd.f32 %v1473_v60, %v1472_v36  ;;  %v1133_v36 = vadd.f32 %v1468_v31, %v2169_v13  ;;  %v1180_v20 = vmax.f32 %v1138_v63, 0.0  ;;  %v1122_v13 = vadd.f32 %v1459_v26, %v2171_v58  ;;  %v2346_v26 = vld [vmem:[#allocation15_spill] sm:$0xff] }
 0x23f   :  { %v1475_v56 = vpop.f32.mrf.mxu1  ;;  %v1408_v31 = vadd.f32 %v1407_v28, %v1406_v47  ;;  %v1447_v58 = vadd.f32 %v2237_v59, %v2235_v43  ;;  %v2333_v59 = vld [vmem:[#allocation10_spill] sm:$0xff] }
 0x240   :  { %v1141_v10 = vadd.f32 %v1474_v33, %v2165_v32  ;;  %v1414_v33 = vadd.f32 %v1413_v12, %v1412_v42  ;;  %v1450_v12 = vadd.f32 %v2245_v35, %v2241_v62  ;;  %v1114_v42 = vadd.f32 %v1453_v19, %v2184_v2  ;;  %v2334_v2 = vld [vmem:[#allocation8_spill] sm:$0xff]  ;;  %v2335_v35 = vld [vmem:[#allocation21_spill] sm:$0xff]  ;;  %v2347_v19 = vld [vmem:[#allocation23_spill] sm:$0xff] }
 0x241   :  { %v1476_v53 = vpop.f32.mrf.mxu1  ;;  %v1106_v63 = vadd.f32 %v1447_v58, %v2334_v2 }
 0x242   :  { %v1477_v55 = vadd.f32 %v1476_v53, %v1475_v56  ;;  %v1181_v53 = vmax.f32 %v1141_v10, 0.0  ;;  %v1178_v10 = vmax.f32 %v1130_v14, 0.0  ;;  %v1061_v29 = vadd.f32 %v1414_v33, %v2177_v39 }
 0x243   :  { %v1478_v61 = vpop.f32.mrf.mxu1  ;;  %v1402_v39 = vadd.f32 %v2253_v4, %v2251_v15  ;;  %v1174_v62 = vmax.f32 %v1114_v42, 0.0  ;;  %v1172_v6 = vmax.f32 %v1106_v63, 0.0 }
 0x244   :  { %v1146_v8 = vadd.f32 %v1477_v55, %v2155_v27  ;;  %v1456_v27 = vadd.f32 %v1455_v24, %v1454_v40  ;;  %v1179_v55 = vmax.f32 %v1133_v36, 0.0  ;;  %v1199_v57 = vpack.c.bf16 %v1181_v53, %v1180_v20  ;;  %v2344_v53 = vld [vmem:[#allocation12_spill] sm:$0xff] }
 0x245   :  { %v1479_v17 = vpop.f32.mrf.mxu1  ;;  %v1045_v40 = vadd.f32 %v1402_v39, %v2337_v21 }
 0x246   :  { %v1480_v30 = vadd.f32 %v1479_v17, %v1478_v61  ;;  %v1182_v56 = vmax.f32 %v1146_v8, 0.0  ;;  %v1125_v61 = vadd.f32 %v1462_v49, %v2173_v0  ;;  %v1117_v22 = vadd.f32 %v1456_v27, %v2190_v3 }
 0x247   :  { %v1198_v49 = vpack.c.bf16 %v1179_v55, %v1178_v10  ;;  %v1405_v17 = vadd.f32 %v1404_v11, %v1403_v38  ;;  %v1161_v3 = vmax.f32 %v1061_v29, 0.0  ;;  %v1109_v8 = vadd.f32 %v1450_v12, %v2201_v50  ;;  %v2341_v38 = vld [vmem:[#allocation14_spill] sm:$0xff]  ;;  %v2343_v11 = vld [vmem:[#allocation16_spill] sm:$0xff]  ;;  %v674_v55 = vpop.permute.xlu0 %673 }
 0x248   :  { %v1149_v23 = vadd.f32 %v1480_v30, %v2157_v37  ;;  %v1411_v37 = vadd.f32 %v1410_v16, %v1409_v41  ;;  %v1177_v0 = vmax.f32 %v1125_v61, 0.0  ;;  %v1053_v30 = vadd.f32 %v1408_v31, %v2197_v5  ;;  %v2348_v29 = vld [vmem:[#allocation20_spill] sm:$0xff] }
 0x249   :  { %v1175_v16 = vmax.f32 %v1117_v22, 0.0  ;;  %v1396_v5 = vadd.f32 %v2336_v44, %v2335_v35  ;;  %v1173_v15 = vmax.f32 %v1109_v8, 0.0  ;;  %v1390_v9 = vadd.f32 %v2342_v7, %v2341_v38  ;;  %v2349_v22 = vld [vmem:[#allocation6_spill] sm:$0xff] }
 0x24a   :  { %v1183_v48 = vmax.f32 %v1149_v23, 0.0  ;;  %v1058_v41 = vadd.f32 %v1411_v37, %v2175_v34  ;;  %v1399_v34 = vadd.f32 %v2249_v45, %v2247_v54  ;;  %v1159_v50 = vmax.f32 %v1053_v30, 0.0  ;;  %v2339_v54 = vld [vmem:[#allocation19_spill] sm:$0xff] }
 0x24b   :  { %v1196_v18 = vpack.c.bf16 %v1175_v16, %v1174_v62  ;;  %v1393_v45 = vadd.f32 %v2339_v54, %v2338_v1  ;;  %v1037_v47 = vadd.f32 %v1396_v5, %v2343_v11  ;;  %v1157_v28 = vmax.f32 %v1045_v40, 0.0 }
 0x24c   :  { %v1200_v32 = vpack.c.bf16 %v1183_v48, %v1182_v56  ;;  %v1160_v43 = vmax.f32 %v1058_v41, 0.0  ;;  %v1195_v36 = vpack.c.bf16 %v1173_v15, %v1172_v6  ;;  %v2345_v56 = vld [vmem:[#allocation13_spill] sm:$0xff]  ;;  %v1202_v41 = vstv %s2311_s6 }
 0x24d   :  { %v1387_v48 = vadd.f32 %v2345_v56, %v2344_v53  ;;  %v1034_v14 = vadd.f32 %v1393_v45, %v2346_v26  ;;  %v1155_v27 = vmax.f32 %v1037_v47, 0.0 }
 0x24e   :  { %1481 = vmatprep.subr.bf16.mxu0 %v1200_v32  ;;  %v1189_v24 = vpack.c.bf16 %v1161_v3, %v1160_v43  ;;  %v679_v32 = vpop.permute.xlu1 %678 }
 0x24f   :  { %1482 = vmatpush3.bf16.msra.mxu0 %v2225_v51  ;;  %v1176_v51 = vmax.f32 %v1122_v13, 0.0  ;;  %v1029_v33 = vadd.f32 %v1390_v9, %v679_v32  ;;  %v1154_v37 = vmax.f32 %v1034_v14, 0.0 }
 0x250   :  { %1483 = vmatprep.subr.bf16.mxu0 %v1199_v57  ;;  %v1026_v57 = vadd.f32 %v1387_v48, %v674_v55 }
 0x251   :  { %v1197_v23 = vpack.c.bf16 %v1177_v0, %v1176_v51  ;;  %v1153_v13 = vmax.f32 %v1029_v33, 0.0  ;;  %v1186_v10 = vpack.c.bf16 %v1155_v27, %v1154_v37  ;;  %v2350_v0 = vld [vmem:[#allocation7_spill] sm:$0xff] }
 0x252   :  { %v1152_v31 = vmax.f32 %v1026_v57, 0.0 }
 0x253   :  { %1484 = vmatpush3.bf16.msra.mxu0 %v2213_v25  ;;  %v1050_v25 = vadd.f32 %v1405_v17, %v2195_v46  ;;  %v2340_v46 = vld [vmem:[#allocation9_spill] sm:$0xff] }
 0x254   :  { %1485 = vmatprep.subr.bf16.mxu0 %v1198_v49  ;;  %v1042_v4 = vadd.f32 %v1399_v34, %v2340_v46  ;;  %v1185_v12 = vpack.c.bf16 %v1153_v13, %v1152_v31  ;;  %v2351_v49 = vrot.slane %v2349_v22, %v2350_v0 }
 0x255   :  { %v1158_v52 = vmax.f32 %v1050_v25, 0.0 }
 0x256   :  { %v1156_v20 = vmax.f32 %v1042_v4, 0.0 }
 0x257   :  { %1486 = vmatpush3.bf16.msra.mxu0 %v2333_v59  ;;  %v1188_v60 = vpack.c.bf16 %v1159_v50, %v1158_v52 }
 0x258   :  { %1487 = vmatprep.subr.bf16.mxu0 %v1197_v23  ;;  %v1187_v61 = vpack.c.bf16 %v1157_v28, %v1156_v20 }
 0x25b   :  { %1488 = vmatpush3.bf16.msra.mxu0 %v1189_v24 }
 0x25c   :  { %1489 = vmatprep.subr.bf16.mxu0 %v1196_v18 }
 0x25f   :  { %1490 = vmatpush3.bf16.msra.mxu0 %v1188_v60 }
 0x260   :  { %1491 = vmatprep.subr.bf16.mxu0 %v1195_v36 }
 0x263   :  { %1492 = vmatpush3.bf16.msra.mxu0 %v1187_v61 }
 0x264   :  { %1493 = vmatprep.subr.bf16.mxu0 %v2347_v19 }
 0x267   :  { %1494 = vmatpush3.bf16.msra.mxu0 %v1186_v10 }
 0x268   :  { %1495 = vmatprep.subr.bf16.mxu0 %v2348_v29 }
 0x26b   :  { %1496 = vmatpush3.bf16.msra.mxu0 %v1185_v12 }
 0x26e   :  { %1261 = vmatmul.mubr.bf16.vlgmr.msra.gmra.mxu0 %v2351_v49 }
 0x32e   :  { %v1497_v17 = vpop.f32.mrf.mxu0 }
 0x330   :  { %v1498_v58 = vpop.f32.mrf.mxu0 }
 0x331   :  { %v1499_v42 = vadd.f32 %v1498_v58, %v1497_v17 }
 0x332   :  { %v1500_v51 = vpop.f32.mrf.mxu0 }
 0x333   :  { %v1263_v39 = vadd.f32 %v1499_v42, %v1202_v41 }
 0x334   :  { %v1501_v30 = vpop.f32.mrf.mxu0 }
 0x335   :  { %v1268_v3 = vmax.f32 %v1263_v39, 0.0 }
 0x337   :  { %1269 = vst [vmem:[#allocation3] sm:$0x1] %v1268_v3 }
 0x338   :  { %1637 = shalt.err (!%p1634_p4)
}
 0x339   :  { %1279 = dma.vmem_to_hbm [thread:$0]  %s1277_s26, 16, %s2312_s7, [#allocation4]  }
 0x33a   :  { %1646 = dma.done.wait [#allocation4], 16  }
 0x33b   :  { %1647 = vsyncadd [#allocation4], 4294967280 }
 0x33c   :  { %1283 = vsyncpa [#allocation4], 1 }

</bundles_post_ra>
